<compile_context>
chip_gen: v7x
topology: tpu7x:2x2x1
jax: 0.10.0
libtpu: 0.0.40
codegen_flags: <defaults>
</compile_context>

<pallas_src>
import numpy as np
import jax
import jax.numpy as jnp
from jax.experimental import pallas as pl
from jax.experimental.pallas import tpu as pltpu

# ---- model hyper-parameters (mirror BiGAT.__init__ defaults, small N) ----
BERT_DIM = 768
RESNET_DIM = 32
EMBED_DIM = 16
GAT_OUT = 32
HEADS = 4
CONCAT_DIM = BERT_DIM + RESNET_DIM + EMBED_DIM   # 816
HID = HEADS * GAT_OUT                            # 128
PAD_IN = 896                                     # next lane multiple >= 816
NEG = -1e30


def _masked_softmax(e_raw, adj_bias):
    """Batched GAT row-softmax for all heads at once.

    e_raw / adj_bias are (HEADS*N, N); row hd*N+i holds head hd's logits for
    destination node i.  adj_bias is 0 on edges (incl. self loops), -1e30 off;
    after row-max subtraction exp() underflows masked lanes to 0.
    """
    e = jnp.where(e_raw > 0, e_raw, 0.2 * e_raw)          # LeakyReLU(0.2)
    e = e + adj_bias
    e = e - jnp.max(e, axis=-1, keepdims=True)
    p = jnp.exp(e)
    return p * pl.reciprocal(jnp.sum(p, axis=-1, keepdims=True), approx=True)


def _stack_head_logits(dst_nat, src_t):
    """dst_nat (N,H), src_t (H,N) -> (HEADS*N, N) raw logits, row hd*N+i."""
    n = dst_nat.shape[0]
    blocks = [jnp.broadcast_to(dst_nat[:, hd:hd + 1], (n, n))
              + jnp.broadcast_to(src_t[hd:hd + 1, :], (n, n))
              for hd in range(HEADS)]
    return jnp.concatenate(blocks, axis=0)


def bigat_kernel(x_ref, w1_ref, b1_ref, w2_ref, asrc_ref, acol_ref,
                 adjt_ref, hmask_ref, hsel_ref, fcb_ref, out_ref):
    n = x_ref.shape[0]
    adjt = adjt_ref[...]              # (H*N, N) per-head-tiled additive mask
    asrc = asrc_ref[...]              # (2H, 128): block-embedded a_src (layer1|layer2)
    acol = acol_ref[...]              # (128, 3H): [a_dst1 | a_dst2 | fc_w/H] block columns

    # ---------------- GAT layer 1 (heads concatenated) ----------------
    h1p = jnp.dot(x_ref[...], w1_ref[...],
                  preferred_element_type=jnp.float32)                         # (N,128) f32
    dst1 = jnp.dot(h1p, acol[:, 0:HEADS], preferred_element_type=jnp.float32)  # (N,H)
    src1 = jax.lax.dot_general(asrc[0:HEADS, :], h1p,
                               (((1,), (1,)), ((), ())),
                               preferred_element_type=jnp.float32)             # (H,N)
    attn1 = _masked_softmax(_stack_head_logits(dst1, src1), adjt)              # (H*N, N)

    # One aggregation matmul for all heads; per-head lane block via hmask rows.
    c1 = jnp.dot(attn1, h1p, preferred_element_type=jnp.float32)               # (H*N, 128)
    h1 = c1[0:n, :] * hmask_ref[0:1, :]
    for hd in range(1, HEADS):
        h1 = h1 + c1[hd * n:(hd + 1) * n, :] * hmask_ref[hd:hd + 1, :]
    h1 = jnp.maximum(h1 + b1_ref[...], 0.0)                                    # +bias, ReLU
    # F.dropout(p=0.6, training=False) is the identity at inference.

    # ------- GAT layer 2 (mean over heads) fused with the final fc -------
    h2p = jnp.dot(h1.astype(jnp.bfloat16), w2_ref[...],
                  preferred_element_type=jnp.float32)                          # (N,128) f32
    dv2 = jnp.dot(h2p, acol[:, HEADS:3 * HEADS],
                  preferred_element_type=jnp.float32)                          # (N,2H): [a_dst | h@fcw/H]
    src2 = jax.lax.dot_general(asrc[HEADS:2 * HEADS, :], h2p,
                               (((1,), (1,)), ((), ())),
                               preferred_element_type=jnp.float32)             # (H,N)
    attn2 = _masked_softmax(_stack_head_logits(dv2[:, 0:HEADS], src2), adjt)   # (H*N, N)

    # Single value matmul for all heads, then head-diagonal select + head sum.
    z = jnp.dot(attn2, dv2[:, HEADS:2 * HEADS],
                preferred_element_type=jnp.float32)                            # (H*N, H)
    zsel = jnp.sum(z * hsel_ref[...], axis=-1, keepdims=True)                  # (H*N, 1)
    logits = zsel[0:n, :]
    for hd in range(1, HEADS):
        logits = logits + zsel[hd * n:(hd + 1) * n, :]
    logits = logits + fcb_ref[0]                    # fcb_ref = b2 @ fc_w + fc_b
    out_ref[...] = pl.reciprocal(1.0 + jnp.exp(-logits), approx=True)          # sigmoid


def _block_rows(v):
    """(H, F) per-head vectors -> (H, H*F): row hd carries v[hd] in its lane block."""
    m = jnp.zeros((HEADS, HID), jnp.float32)
    for hd in range(HEADS):
        m = m.at[hd, hd * GAT_OUT:(hd + 1) * GAT_OUT].set(v[hd])
    return m


def prepare_bigat(params, adj):
    """One-time (per weights/graph) prep.  Everything static — weight padding,
    casts, block-embedded attention vectors, the tiled adjacency bias, head
    masks and the folded fc bias — is computed once and cached so the per-call
    path is only the x pad/cast plus the Pallas kernel."""
    (w1, as1, ad1, b1, w2, as2, ad2, b2, fcw, fcb) = params
    n = adj.shape[0]

    w1_p = jnp.pad(w1, ((0, PAD_IN - w1.shape[0]), (0, 0))).astype(jnp.bfloat16)
    w2_b = w2.astype(jnp.bfloat16)

    # Packed block-embedded attention vectors (layer1 | layer2 | fc-fold).
    asrc = jnp.concatenate([_block_rows(as1), _block_rows(as2)], axis=0)        # (2H, 128)
    fcw_heads = jnp.broadcast_to(fcw[:, 0], (HEADS, GAT_OUT)) / HEADS           # fold 1/H mean
    acol = jnp.concatenate([_block_rows(ad1), _block_rows(ad2),
                            _block_rows(fcw_heads)], axis=0).T                  # (128, 3H)

    # Additive adjacency mask (0 on edges incl. self loops, -1e30 elsewhere),
    # tiled once per head block for the batched softmax.
    adj_bias = jnp.where(adj > 0, 0.0, NEG).astype(jnp.float32)
    adjt = jnp.tile(adj_bias, (HEADS, 1))                                        # (H*N, N)

    # Head lane-block mask (layer-1 extract) and head-diagonal select (layer-2).
    hmask = _block_rows(jnp.ones((HEADS, GAT_OUT), jnp.float32))                 # (H, 128)
    hsel = jnp.kron(jnp.eye(HEADS, dtype=jnp.float32),
                    jnp.ones((n, 1), jnp.float32))                               # (H*N, H)

    # gat2 bias and fc bias fold into one scalar (fc is linear): b2 @ fcw + fcb.
    fcb_eff = (b2 @ fcw + fcb).reshape((1,)).astype(jnp.float32)

    prep = (w1_p, b1, w2_b, asrc, acol, adjt, hmask, hsel, fcb_eff)
    return jax.tree_util.tree_map(jnp.asarray, prep)


@jax.jit
def bigat_pallas(x, prep):
    (w1_p, b1, w2_b, asrc, acol, adjt, hmask, hsel, fcb_eff) = prep
    n, din = x.shape
    x_p = jnp.pad(x, ((0, 0), (0, PAD_IN - din))).astype(jnp.bfloat16)

    vmem = pl.BlockSpec(memory_space=pltpu.MemorySpace.VMEM)
    smem = pl.BlockSpec(memory_space=pltpu.MemorySpace.SMEM)
    return pl.pallas_call(
        bigat_kernel,
        out_shape=jax.ShapeDtypeStruct((n, 1), jnp.float32),
        in_specs=[vmem] * 9 + [smem],
        out_specs=vmem,
        # N=8: everything fits in VMEM, no grid needed.
        # TODO(synk): for large N / batched graphs, add a row-tiled grid with
        # dimension_semantics=("parallel",) and an online softmax over
        # adjacency column blocks (int8 mask) to fit v7x's smaller VMEM.
    )(x_p, w1_p, b1, w2_b, asrc, acol, adjt, hmask, hsel, fcb_eff)


def bigat_reference(x, adj, params):
    """Pure-JAX f32 reference of the same dense-GAT forward (for validation)."""
    (w1, as1, ad1, b1, w2, as2, ad2, b2, fcw, fcb) = params

    def gat(xx, w, a_s, a_d, bias, concat):
        h = xx @ w
        outs = []
        for hd in range(HEADS):
            hh = h[:, hd * GAT_OUT:(hd + 1) * GAT_OUT]
            e = (hh @ a_d[hd])[:, None] + (hh @ a_s[hd])[None, :]
            e = jnp.where(e > 0, e, 0.2 * e)
            e = jnp.where(adj > 0, e, -jnp.inf)
            outs.append(jax.nn.softmax(e, axis=-1) @ hh)
        out = jnp.concatenate(outs, axis=-1) if concat else sum(outs) / HEADS
        return out + bias

    h1 = jax.nn.relu(gat(x, w1, as1, ad1, b1, True))
    h2 = gat(h1, w2, as2, ad2, b2, False)
    return jax.nn.sigmoid(h2 @ fcw + fcb)


if __name__ == "__main__":
    key = jax.random.PRNGKey(0)
    ks = jax.random.split(key, 12)

    # ---- synthetic "upstream" features -------------------------------------
    num_users_table = 10
    n_users, n_items = 4, 4
    n_nodes = n_users + n_items

    user_ids = [3, 1, 7, 5]
    # mirror the dict-based remapping in the PyTorch forward (host-side glue)
    user_id_to_index = {uid: idx for idx, uid in enumerate(user_ids)}
    user_indices = np.array([user_id_to_index[u] for u in user_ids], np.int32)

    # TODO(synk): bert-base-chinese encoder + tokenizer not implementable in
    # Pallas; mean-pooled last_hidden_state is synthesized deterministically.
    item_title_feats = jax.random.normal(ks[0], (n_items, BERT_DIM), jnp.float32)
    # TODO(synk): ResNet-50 backbone + image transforms not implementable in
    # Pallas; its resnet_output_dim projection output is synthesized.
    item_image_feats = jax.random.normal(ks[1], (n_items, RESNET_DIM), jnp.float32)

    user_emb_table = jax.random.normal(ks[2], (num_users_table, EMBED_DIM), jnp.float32) * 0.1
    user_emb = user_emb_table[jnp.asarray(user_indices)]            # (n_users, EMBED_DIM)

    # ---- node-feature assembly (glue, matches the torch padding/concat) ----
    items_tensor = jnp.concatenate([item_title_feats, item_image_feats], axis=1)  # (n_items, 800)
    users_len = user_emb.shape[1]
    items_len = items_tensor.shape[1]
    users_padded = jnp.pad(user_emb, ((0, 0), (0, items_len)))      # (n_users, 816)
    items_padded = jnp.pad(items_tensor, ((0, 0), (users_len, 0)))  # (n_items, 816)
    x = jnp.concatenate([users_padded, items_padded], axis=0)       # (8, 816)

    # ---- edge_matrix: PyG-style edge_index (2, E), bipartite + reverse ----
    pairs = [(0, 4), (0, 5), (1, 5), (1, 6), (2, 6), (2, 7), (3, 7), (3, 4)]
    src = np.array([u for u, i in pairs] + [i for u, i in pairs], np.int32)
    dst = np.array([i for u, i in pairs] + [u for u, i in pairs], np.int32)

    adj = jnp.zeros((n_nodes, n_nodes), jnp.float32)
    adj = adj.at[jnp.asarray(dst), jnp.asarray(src)].set(1.0)       # adj[target, source]
    adj = jnp.maximum(adj, jnp.eye(n_nodes, dtype=jnp.float32))     # add_self_loops=True

    # ---- deterministic GAT / fc parameters ---------------------------------
    def glorot(k, shape):
        fan = sum(shape)
        return jax.random.normal(k, shape, jnp.float32) * jnp.sqrt(2.0 / fan)

    w1 = glorot(ks[3], (CONCAT_DIM, HEADS * GAT_OUT))               # (816, 128)
    as1 = glorot(ks[4], (HEADS, GAT_OUT))
    ad1 = glorot(ks[5], (HEADS, GAT_OUT))
    b1 = jnp.zeros((1, HEADS * GAT_OUT), jnp.float32)

    w2 = glorot(ks[6], (HEADS * GAT_OUT, HEADS * GAT_OUT))          # (128, 128)
    as2 = glorot(ks[7], (HEADS, GAT_OUT))
    ad2 = glorot(ks[8], (HEADS, GAT_OUT))
    b2 = jnp.zeros((1, GAT_OUT), jnp.float32)

    fcw = glorot(ks[9], (GAT_OUT, 1))                               # (32, 1)
    fcb = jnp.zeros((1, 1), jnp.float32)

    params = (w1, as1, ad1, b1, w2, as2, ad2, b2, fcw, fcb)

    # One-time static prep (cached), then the lean per-call forward.
    prep = jax.block_until_ready(prepare_bigat(params, adj))
    out = bigat_pallas(x, prep)
    out = jax.block_until_ready(out)
    ref = bigat_reference(x, adj, params)

    assert out.shape == (n_nodes, 1)
    assert bool(jnp.all(jnp.isfinite(out)))
    assert bool(jnp.all((out >= 0.0) & (out <= 1.0)))
    np.testing.assert_allclose(np.asarray(out), np.asarray(ref), atol=0.06)
    print("KERNEL_OK")
</pallas_src>

<mosaic_0001>
module attributes {stable_mosaic.version = 11 : i64} {
  func.func @bigat_kernel(%arg0: memref<8x896xbf16, #tpu.memory_space<vmem>>, %arg1: memref<896x128xbf16, #tpu.memory_space<vmem>>, %arg2: memref<1x128xf32, #tpu.memory_space<vmem>>, %arg3: memref<128x128xbf16, #tpu.memory_space<vmem>>, %arg4: memref<8x128xf32, #tpu.memory_space<vmem>>, %arg5: memref<128x12xf32, #tpu.memory_space<vmem>>, %arg6: memref<32x8xf32, #tpu.memory_space<vmem>>, %arg7: memref<4x128xf32, #tpu.memory_space<vmem>>, %arg8: memref<32x4xf32, #tpu.memory_space<vmem>>, %arg9: memref<1xf32, #tpu.memory_space<smem>>, %arg10: memref<8x1xf32, #tpu.memory_space<vmem>>) attributes {dimension_semantics = [], scalar_prefetch = 0 : i64, scratch_operands = 0 : i64, tpu.core_type = #tpu.core_type<tc>} {
    %c0 = arith.constant 0 : index
    %c0_0 = arith.constant 0 : index
    %0 = vector.load %arg6[%c0, %c0_0] : memref<32x8xf32, #tpu.memory_space<vmem>>, vector<32x8xf32>
    %c0_1 = arith.constant 0 : index
    %c0_2 = arith.constant 0 : index
    %1 = vector.load %arg4[%c0_1, %c0_2] : memref<8x128xf32, #tpu.memory_space<vmem>>, vector<8x128xf32>
    %c0_3 = arith.constant 0 : index
    %c0_4 = arith.constant 0 : index
    %2 = vector.load %arg5[%c0_3, %c0_4] : memref<128x12xf32, #tpu.memory_space<vmem>>, vector<128x12xf32>
    %c0_5 = arith.constant 0 : index
    %c0_6 = arith.constant 0 : index
    %3 = vector.load %arg0[%c0_5, %c0_6] : memref<8x896xbf16, #tpu.memory_space<vmem>>, vector<8x896xbf16>
    %c0_7 = arith.constant 0 : index
    %c0_8 = arith.constant 0 : index
    %4 = vector.load %arg1[%c0_7, %c0_8] : memref<896x128xbf16, #tpu.memory_space<vmem>>, vector<896x128xbf16>
    %cst = arith.constant dense<0.000000e+00> : vector<8x128xf32>
    %5 = tpu.matmul %3, %4, %cst {dimension_numbers = #tpu.dot_dimension_numbers<[1], [0], [0], [1], [0, 0, 1, 1], [], []>} : vector<8x896xbf16>, vector<896x128xbf16>, vector<8x128xf32> -> vector<8x128xf32>
    %6 = vector.extract_strided_slice %2 {offsets = [0, 0], sizes = [128, 4], strides = [1, 1]} : vector<128x12xf32> to vector<128x4xf32>
    %cst_9 = arith.constant dense<0.000000e+00> : vector<8x4xf32>
    %7 = tpu.matmul %5, %6, %cst_9 {dimension_numbers = #tpu.dot_dimension_numbers<[1], [0], [0], [1], [0, 0, 1, 1], [], []>} : vector<8x128xf32>, vector<128x4xf32>, vector<8x4xf32> -> vector<8x4xf32>
    %8 = vector.extract_strided_slice %1 {offsets = [0, 0], sizes = [4, 128], strides = [1, 1]} : vector<8x128xf32> to vector<4x128xf32>
    %cst_10 = arith.constant dense<0.000000e+00> : vector<4x8xf32>
    %9 = tpu.matmul %8, %5, %cst_10 {dimension_numbers = #tpu.dot_dimension_numbers<[1], [1], [0], [0], [0, 0, 1, 0], [], []>} : vector<4x128xf32>, vector<8x128xf32>, vector<4x8xf32> -> vector<4x8xf32>
    %10 = vector.extract_strided_slice %7 {offsets = [0, 0], sizes = [8, 1], strides = [1, 1]} : vector<8x4xf32> to vector<8x1xf32>
    %11 = vector.shape_cast %10 : vector<8x1xf32> to vector<8x1xf32>
    %12 = vector.broadcast %11 : vector<8x1xf32> to vector<8x8xf32>
    %13 = vector.extract_strided_slice %9 {offsets = [0, 0], sizes = [1, 8], strides = [1, 1]} : vector<4x8xf32> to vector<1x8xf32>
    %14 = vector.shape_cast %13 : vector<1x8xf32> to vector<1x8xf32>
    %15 = vector.broadcast %14 : vector<1x8xf32> to vector<8x8xf32>
    %16 = arith.addf %12, %15 : vector<8x8xf32>
    %17 = vector.extract_strided_slice %7 {offsets = [0, 1], sizes = [8, 1], strides = [1, 1]} : vector<8x4xf32> to vector<8x1xf32>
    %18 = vector.shape_cast %17 : vector<8x1xf32> to vector<8x1xf32>
    %19 = vector.broadcast %18 : vector<8x1xf32> to vector<8x8xf32>
    %20 = vector.extract_strided_slice %9 {offsets = [1, 0], sizes = [1, 8], strides = [1, 1]} : vector<4x8xf32> to vector<1x8xf32>
    %21 = vector.shape_cast %20 : vector<1x8xf32> to vector<1x8xf32>
    %22 = vector.broadcast %21 : vector<1x8xf32> to vector<8x8xf32>
    %23 = arith.addf %19, %22 : vector<8x8xf32>
    %24 = vector.extract_strided_slice %7 {offsets = [0, 2], sizes = [8, 1], strides = [1, 1]} : vector<8x4xf32> to vector<8x1xf32>
    %25 = vector.shape_cast %24 : vector<8x1xf32> to vector<8x1xf32>
    %26 = vector.broadcast %25 : vector<8x1xf32> to vector<8x8xf32>
    %27 = vector.extract_strided_slice %9 {offsets = [2, 0], sizes = [1, 8], strides = [1, 1]} : vector<4x8xf32> to vector<1x8xf32>
    %28 = vector.shape_cast %27 : vector<1x8xf32> to vector<1x8xf32>
    %29 = vector.broadcast %28 : vector<1x8xf32> to vector<8x8xf32>
    %30 = arith.addf %26, %29 : vector<8x8xf32>
    %31 = vector.extract_strided_slice %7 {offsets = [0, 3], sizes = [8, 1], strides = [1, 1]} : vector<8x4xf32> to vector<8x1xf32>
    %32 = vector.shape_cast %31 : vector<8x1xf32> to vector<8x1xf32>
    %33 = vector.broadcast %32 : vector<8x1xf32> to vector<8x8xf32>
    %34 = vector.extract_strided_slice %9 {offsets = [3, 0], sizes = [1, 8], strides = [1, 1]} : vector<4x8xf32> to vector<1x8xf32>
    %35 = vector.shape_cast %34 : vector<1x8xf32> to vector<1x8xf32>
    %36 = vector.broadcast %35 : vector<1x8xf32> to vector<8x8xf32>
    %37 = arith.addf %33, %36 : vector<8x8xf32>
    %38 = tpu.concatenate %16, %23, %30, %37 in 0 : vector<8x8xf32>, vector<8x8xf32>, vector<8x8xf32>, vector<8x8xf32> -> vector<32x8xf32>
    %cst_11 = arith.constant 0.000000e+00 : f32
    %39 = vector.broadcast %cst_11 : f32 to vector<32x8xf32>
    %40 = arith.cmpf ogt, %38, %39 : vector<32x8xf32>
    %cst_12 = arith.constant 2.000000e-01 : f32
    %41 = vector.broadcast %cst_12 : f32 to vector<32x8xf32>
    %42 = arith.mulf %41, %38 : vector<32x8xf32>
    %43 = arith.select %40, %38, %42 : vector<32x8xi1>, vector<32x8xf32>
    %44 = arith.addf %43, %0 : vector<32x8xf32>
    %cst_13 = arith.constant dense<0xFF800000> : vector<32xf32>
    %45 = vector.multi_reduction <maximumf>, %44, %cst_13 [1] : vector<32x8xf32> to vector<32xf32>
    %46 = vector.shape_cast %45 : vector<32xf32> to vector<32x1xf32>
    %47 = vector.broadcast %46 : vector<32x1xf32> to vector<32x8xf32>
    %48 = arith.subf %44, %47 : vector<32x8xf32>
    %49 = math.exp %48 : vector<32x8xf32>
    %cst_14 = arith.constant dense<0.000000e+00> : vector<32xf32>
    %50 = vector.multi_reduction <add>, %49, %cst_14 [1] : vector<32x8xf32> to vector<32xf32>
    %51 = vector.shape_cast %50 : vector<32xf32> to vector<32x1xf32>
    %52 = tpu.reciprocal %51 {approx = true} : vector<32x1xf32> -> vector<32x1xf32>
    %53 = vector.broadcast %52 : vector<32x1xf32> to vector<32x8xf32>
    %54 = arith.mulf %49, %53 : vector<32x8xf32>
    %cst_15 = arith.constant dense<0.000000e+00> : vector<32x128xf32>
    %55 = tpu.matmul %54, %5, %cst_15 {dimension_numbers = #tpu.dot_dimension_numbers<[1], [0], [0], [1], [0, 0, 1, 1], [], []>} : vector<32x8xf32>, vector<8x128xf32>, vector<32x128xf32> -> vector<32x128xf32>
    %56 = vector.extract_strided_slice %55 {offsets = [0, 0], sizes = [8, 128], strides = [1, 1]} : vector<32x128xf32> to vector<8x128xf32>
    %c0_16 = arith.constant 0 : index
    %c0_17 = arith.constant 0 : index
    %57 = vector.load %arg7[%c0_16, %c0_17] : memref<4x128xf32, #tpu.memory_space<vmem>>, vector<1x128xf32>
    %58 = vector.broadcast %57 : vector<1x128xf32> to vector<8x128xf32>
    %59 = arith.mulf %56, %58 : vector<8x128xf32>
    %60 = vector.extract_strided_slice %55 {offsets = [8, 0], sizes = [8, 128], strides = [1, 1]} : vector<32x128xf32> to vector<8x128xf32>
    %c1 = arith.constant 1 : index
    %c0_18 = arith.constant 0 : index
    %61 = vector.load %arg7[%c1, %c0_18] : memref<4x128xf32, #tpu.memory_space<vmem>>, vector<1x128xf32>
    %62 = vector.broadcast %61 : vector<1x128xf32> to vector<8x128xf32>
    %63 = arith.mulf %60, %62 : vector<8x128xf32>
    %64 = arith.addf %59, %63 : vector<8x128xf32>
    %65 = vector.extract_strided_slice %55 {offsets = [16, 0], sizes = [8, 128], strides = [1, 1]} : vector<32x128xf32> to vector<8x128xf32>
    %c2 = arith.constant 2 : index
    %c0_19 = arith.constant 0 : index
    %66 = vector.load %arg7[%c2, %c0_19] : memref<4x128xf32, #tpu.memory_space<vmem>>, vector<1x128xf32>
    %67 = vector.broadcast %66 : vector<1x128xf32> to vector<8x128xf32>
    %68 = arith.mulf %65, %67 : vector<8x128xf32>
    %69 = arith.addf %64, %68 : vector<8x128xf32>
    %70 = vector.extract_strided_slice %55 {offsets = [24, 0], sizes = [8, 128], strides = [1, 1]} : vector<32x128xf32> to vector<8x128xf32>
    %c3 = arith.constant 3 : index
    %c0_20 = arith.constant 0 : index
    %71 = vector.load %arg7[%c3, %c0_20] : memref<4x128xf32, #tpu.memory_space<vmem>>, vector<1x128xf32>
    %72 = vector.broadcast %71 : vector<1x128xf32> to vector<8x128xf32>
    %73 = arith.mulf %70, %72 : vector<8x128xf32>
    %74 = arith.addf %69, %73 : vector<8x128xf32>
    %c0_21 = arith.constant 0 : index
    %c0_22 = arith.constant 0 : index
    %75 = vector.load %arg2[%c0_21, %c0_22] : memref<1x128xf32, #tpu.memory_space<vmem>>, vector<1x128xf32>
    %76 = vector.broadcast %75 : vector<1x128xf32> to vector<8x128xf32>
    %77 = arith.addf %74, %76 : vector<8x128xf32>
    %cst_23 = arith.constant 0.000000e+00 : f32
    %78 = vector.broadcast %cst_23 : f32 to vector<8x128xf32>
    %79 = arith.maximumf %77, %78 : vector<8x128xf32>
    %80 = arith.truncf %79 : vector<8x128xf32> to vector<8x128xbf16>
    %c0_24 = arith.constant 0 : index
    %c0_25 = arith.constant 0 : index
    %81 = vector.load %arg3[%c0_24, %c0_25] : memref<128x128xbf16, #tpu.memory_space<vmem>>, vector<128x128xbf16>
    %cst_26 = arith.constant dense<0.000000e+00> : vector<8x128xf32>
    %82 = tpu.matmul %80, %81, %cst_26 {dimension_numbers = #tpu.dot_dimension_numbers<[1], [0], [0], [1], [0, 0, 1, 1], [], []>} : vector<8x128xbf16>, vector<128x128xbf16>, vector<8x128xf32> -> vector<8x128xf32>
    %83 = vector.extract_strided_slice %2 {offsets = [0, 4], sizes = [128, 8], strides = [1, 1]} : vector<128x12xf32> to vector<128x8xf32>
    %cst_27 = arith.constant dense<0.000000e+00> : vector<8x8xf32>
    %84 = tpu.matmul %82, %83, %cst_27 {dimension_numbers = #tpu.dot_dimension_numbers<[1], [0], [0], [1], [0, 0, 1, 1], [], []>} : vector<8x128xf32>, vector<128x8xf32>, vector<8x8xf32> -> vector<8x8xf32>
    %85 = vector.extract_strided_slice %1 {offsets = [4, 0], sizes = [4, 128], strides = [1, 1]} : vector<8x128xf32> to vector<4x128xf32>
    %cst_28 = arith.constant dense<0.000000e+00> : vector<4x8xf32>
    %86 = tpu.matmul %85, %82, %cst_28 {dimension_numbers = #tpu.dot_dimension_numbers<[1], [1], [0], [0], [0, 0, 1, 0], [], []>} : vector<4x128xf32>, vector<8x128xf32>, vector<4x8xf32> -> vector<4x8xf32>
    %87 = vector.extract_strided_slice %84 {offsets = [0, 0], sizes = [8, 4], strides = [1, 1]} : vector<8x8xf32> to vector<8x4xf32>
    %88 = vector.extract_strided_slice %87 {offsets = [0, 0], sizes = [8, 1], strides = [1, 1]} : vector<8x4xf32> to vector<8x1xf32>
    %89 = vector.shape_cast %88 : vector<8x1xf32> to vector<8x1xf32>
    %90 = vector.broadcast %89 : vector<8x1xf32> to vector<8x8xf32>
    %91 = vector.extract_strided_slice %86 {offsets = [0, 0], sizes = [1, 8], strides = [1, 1]} : vector<4x8xf32> to vector<1x8xf32>
    %92 = vector.shape_cast %91 : vector<1x8xf32> to vector<1x8xf32>
    %93 = vector.broadcast %92 : vector<1x8xf32> to vector<8x8xf32>
    %94 = arith.addf %90, %93 : vector<8x8xf32>
    %95 = vector.extract_strided_slice %87 {offsets = [0, 1], sizes = [8, 1], strides = [1, 1]} : vector<8x4xf32> to vector<8x1xf32>
    %96 = vector.shape_cast %95 : vector<8x1xf32> to vector<8x1xf32>
    %97 = vector.broadcast %96 : vector<8x1xf32> to vector<8x8xf32>
    %98 = vector.extract_strided_slice %86 {offsets = [1, 0], sizes = [1, 8], strides = [1, 1]} : vector<4x8xf32> to vector<1x8xf32>
    %99 = vector.shape_cast %98 : vector<1x8xf32> to vector<1x8xf32>
    %100 = vector.broadcast %99 : vector<1x8xf32> to vector<8x8xf32>
    %101 = arith.addf %97, %100 : vector<8x8xf32>
    %102 = vector.extract_strided_slice %87 {offsets = [0, 2], sizes = [8, 1], strides = [1, 1]} : vector<8x4xf32> to vector<8x1xf32>
    %103 = vector.shape_cast %102 : vector<8x1xf32> to vector<8x1xf32>
    %104 = vector.broadcast %103 : vector<8x1xf32> to vector<8x8xf32>
    %105 = vector.extract_strided_slice %86 {offsets = [2, 0], sizes = [1, 8], strides = [1, 1]} : vector<4x8xf32> to vector<1x8xf32>
    %106 = vector.shape_cast %105 : vector<1x8xf32> to vector<1x8xf32>
    %107 = vector.broadcast %106 : vector<1x8xf32> to vector<8x8xf32>
    %108 = arith.addf %104, %107 : vector<8x8xf32>
    %109 = vector.extract_strided_slice %87 {offsets = [0, 3], sizes = [8, 1], strides = [1, 1]} : vector<8x4xf32> to vector<8x1xf32>
    %110 = vector.shape_cast %109 : vector<8x1xf32> to vector<8x1xf32>
    %111 = vector.broadcast %110 : vector<8x1xf32> to vector<8x8xf32>
    %112 = vector.extract_strided_slice %86 {offsets = [3, 0], sizes = [1, 8], strides = [1, 1]} : vector<4x8xf32> to vector<1x8xf32>
    %113 = vector.shape_cast %112 : vector<1x8xf32> to vector<1x8xf32>
    %114 = vector.broadcast %113 : vector<1x8xf32> to vector<8x8xf32>
    %115 = arith.addf %111, %114 : vector<8x8xf32>
    %116 = tpu.concatenate %94, %101, %108, %115 in 0 : vector<8x8xf32>, vector<8x8xf32>, vector<8x8xf32>, vector<8x8xf32> -> vector<32x8xf32>
    %cst_29 = arith.constant 0.000000e+00 : f32
    %117 = vector.broadcast %cst_29 : f32 to vector<32x8xf32>
    %118 = arith.cmpf ogt, %116, %117 : vector<32x8xf32>
    %cst_30 = arith.constant 2.000000e-01 : f32
    %119 = vector.broadcast %cst_30 : f32 to vector<32x8xf32>
    %120 = arith.mulf %119, %116 : vector<32x8xf32>
    %121 = arith.select %118, %116, %120 : vector<32x8xi1>, vector<32x8xf32>
    %122 = arith.addf %121, %0 : vector<32x8xf32>
    %cst_31 = arith.constant dense<0xFF800000> : vector<32xf32>
    %123 = vector.multi_reduction <maximumf>, %122, %cst_31 [1] : vector<32x8xf32> to vector<32xf32>
    %124 = vector.shape_cast %123 : vector<32xf32> to vector<32x1xf32>
    %125 = vector.broadcast %124 : vector<32x1xf32> to vector<32x8xf32>
    %126 = arith.subf %122, %125 : vector<32x8xf32>
    %127 = math.exp %126 : vector<32x8xf32>
    %cst_32 = arith.constant dense<0.000000e+00> : vector<32xf32>
    %128 = vector.multi_reduction <add>, %127, %cst_32 [1] : vector<32x8xf32> to vector<32xf32>
    %129 = vector.shape_cast %128 : vector<32xf32> to vector<32x1xf32>
    %130 = tpu.reciprocal %129 {approx = true} : vector<32x1xf32> -> vector<32x1xf32>
    %131 = vector.broadcast %130 : vector<32x1xf32> to vector<32x8xf32>
    %132 = arith.mulf %127, %131 : vector<32x8xf32>
    %133 = vector.extract_strided_slice %84 {offsets = [0, 4], sizes = [8, 4], strides = [1, 1]} : vector<8x8xf32> to vector<8x4xf32>
    %cst_33 = arith.constant dense<0.000000e+00> : vector<32x4xf32>
    %134 = tpu.matmul %132, %133, %cst_33 {dimension_numbers = #tpu.dot_dimension_numbers<[1], [0], [0], [1], [0, 0, 1, 1], [], []>} : vector<32x8xf32>, vector<8x4xf32>, vector<32x4xf32> -> vector<32x4xf32>
    %c0_34 = arith.constant 0 : index
    %c0_35 = arith.constant 0 : index
    %135 = vector.load %arg8[%c0_34, %c0_35] : memref<32x4xf32, #tpu.memory_space<vmem>>, vector<32x4xf32>
    %136 = arith.mulf %134, %135 : vector<32x4xf32>
    %cst_36 = arith.constant dense<0.000000e+00> : vector<32xf32>
    %137 = vector.multi_reduction <add>, %136, %cst_36 [1] : vector<32x4xf32> to vector<32xf32>
    %138 = vector.shape_cast %137 : vector<32xf32> to vector<32x1xf32>
    %139 = vector.extract_strided_slice %138 {offsets = [0, 0], sizes = [8, 1], strides = [1, 1]} : vector<32x1xf32> to vector<8x1xf32>
    %140 = vector.extract_strided_slice %138 {offsets = [8, 0], sizes = [8, 1], strides = [1, 1]} : vector<32x1xf32> to vector<8x1xf32>
    %141 = arith.addf %139, %140 : vector<8x1xf32>
    %142 = vector.extract_strided_slice %138 {offsets = [16, 0], sizes = [8, 1], strides = [1, 1]} : vector<32x1xf32> to vector<8x1xf32>
    %143 = arith.addf %141, %142 : vector<8x1xf32>
    %144 = vector.extract_strided_slice %138 {offsets = [24, 0], sizes = [8, 1], strides = [1, 1]} : vector<32x1xf32> to vector<8x1xf32>
    %145 = arith.addf %143, %144 : vector<8x1xf32>
    %c0_37 = arith.constant 0 : index
    %146 = memref.load %arg9[%c0_37] : memref<1xf32, #tpu.memory_space<smem>>
    %147 = vector.broadcast %146 : f32 to vector<8x1xf32>
    %148 = arith.addf %145, %147 : vector<8x1xf32>
    %cst_38 = arith.constant 0.000000e+00 : f32
    %149 = vector.broadcast %cst_38 : f32 to vector<8x1xf32>
    %150 = arith.subf %149, %148 : vector<8x1xf32>
    %151 = math.exp %150 : vector<8x1xf32>
    %cst_39 = arith.constant 1.000000e+00 : f32
    %152 = vector.broadcast %cst_39 : f32 to vector<8x1xf32>
    %153 = arith.addf %152, %151 : vector<8x1xf32>
    %154 = tpu.reciprocal %153 {approx = true} : vector<8x1xf32> -> vector<8x1xf32>
    %c0_40 = arith.constant 0 : index
    %c0_41 = arith.constant 0 : index
    %155 = vector.load %arg10[%c0_40, %c0_41] : memref<8x1xf32, #tpu.memory_space<vmem>>, vector<8x1xf32>
    tpu.vector_store %arg10[%c0_40, %c0_41], %154 {strides = array<i32>} : memref<8x1xf32, #tpu.memory_space<vmem>>, vector<8x1xf32>,
    return
  }
}

</mosaic_0001>

<bundles_post_ra>
// kernel: bigat_pallas.1
= control target key start
LH: loop header
LB: loop body
LE: loop exit
PB: predicated region body
PF: predicated region fallthrough
CT: control target
= control target key end

     0   :  { %16 = vsyncpa [#allocation4], 0  ;;  %s2217_s13 = smov [#allocation3]   ;;  %s2627_s0 = inlined_call_operand.vmem [shape: bf16[8,896], index: 0, kind: input, shape index: {}]   ;;  %s2628_s1 = inlined_call_operand.hbm [shape: bf16[896,128], index: 1, kind: input, shape index: {}]   ;;  %s2629_s2 = inlined_call_operand.vmem [shape: f32[1,128], index: 2, kind: input, shape index: {}]   ;;  %s2630_s3 = inlined_call_operand.vmem [shape: bf16[128,128], index: 3, kind: input, shape index: {}]   ;;  %s2631_s4 = inlined_call_operand.vmem [shape: f32[8,128], index: 4, kind: input, shape index: {}]   ;;  %s2632_s5 = inlined_call_operand.vmem [shape: f32[128,12], index: 5, kind: input, shape index: {}]   ;;  %s2633_s6 = inlined_call_operand.vmem [shape: f32[32,8], index: 6, kind: input, shape index: {}]   ;;  %s2634_s7 = inlined_call_operand.vmem [shape: f32[4,128], index: 7, kind: input, shape index: {}]   ;;  %s2635_s8 = inlined_call_operand.vmem [shape: f32[32,4], index: 8, kind: input, shape index: {}]   ;;  %s2636_s9 = inlined_call_operand.<no memory space> [shape: f32[1], index: 9, kind: input, shape index: {}]   ;;  %s2637_s10 = inlined_call_operand.vmem [shape: f32[8,1], index: 10, kind: output, shape index: {}]  }
   0x1   :  { %s24_s14 = sshll.u32 %s2217_s13, 4  ;;  %s2193_s17 = scalar_lea.hbm %s2628_s1, 7168  ;;  %s25_s14 = int_to_ptr.vmem [resolvable:$true] %s24_s14 }
   0x2   :  { %p2194_p0 = scmp.ne.s32.totalorder %s2628_s1, %s2193_s17  ;;  %p2197_p1 = scmp.lt.u32.totalorder %s2193_s17, %s2628_s1 }
   0x4   :  { %p2199_p2 = pnand %p2197_p1, %p2194_p0 }
   0x6   :  { %2202 = shalt.err (!%p2199_p2)
}
   0x7   :  { %s2203_s22 = scalar_lea.vmem %s25_s14, 7168  ;;  %p2208_p4 = scmp.lt.s32.totalorder %s25_s14, %s25_s14 }
   0x8   :  { %p2204_p3 = scmp.ne.s32.totalorder %s25_s14, %s2203_s22  ;;  %p2209_p5 = scmp.lt.s32.totalorder %s2203_s22, %s2203_s22 }
   0xa   :  { %p2210_p6 = por %p2209_p5, %p2208_p4 }
   0xc   :  { %p2211_p7 = pnand %p2210_p6, %p2204_p3 }
   0xe   :  { %2214 = shalt.err (!%p2211_p7)
}
   0xf   :  { %s2218_s23 = smov 64   ;;  %s2219_s24 = smov 4  }
  0x10   :  { %30 = dma.hbm_to_vmem [thread:$0]  %s2628_s1, 7168, %s25_s14, [#allocation4], %s2218_s23, %s2218_s23, %s2219_s24  }
  0x11   :  { %2215 = dma.done.wait [#allocation4], 7168  }
  0x12   :  { %2216 = vsyncadd [#allocation4], 4294960128  ;;  %v2086_v0 = vld [vmem:[#allocation3 + $0x40] sm:$0xff]   ;;  %v2090_v4 = vld [vmem:[#allocation3 + $0x48] sm:$0xff]   ;;  %v2220_v40 = vmov 0.0   ;;  %vm2221_vm0 = vmmov 0  }
  0x13   :  { %v2087_v1 = vld [vmem:[#allocation3 + $0xc0] sm:$0xff]   ;;  %1712 = vmatprep.subr.bf16.mxu0 %v2086_v0  ;;  %v2091_v5 = vld [vmem:[#allocation3 + $0xc8] sm:$0xff]   ;;  %v2094_v8 = vld [vmem:[#allocation3 + $0x50] sm:$0xff]   ;;  %vm902_vm2 = vcmask 64512   ;;  %s2227_s23 = smov 124   ;;  %vm1597_vm10 = vcmask 31744  }
  0x14   :  { %v2088_v2 = vld [vmem:[#allocation3] sm:$0xff]   ;;  %1734 = vmatprep.subr.bf16.mxu1 %v2087_v1  ;;  %v2092_v6 = vld [vmem:[#allocation3 + $0x8] sm:$0xff]   ;;  %v2095_v9 = vld [vmem:[#allocation3 + $0xd0] sm:$0xff]   ;;  %vm1621_vm11 = vcmask 7168  }
  0x15   :  { %v2089_v3 = vld [vmem:[#allocation3 + $0x80] sm:$0xff]   ;;  %1713 = vmatpush3.bf16.msra.mxu0 %v2088_v2  ;;  %v2093_v7 = vld [vmem:[#allocation3 + $0x88] sm:$0xff]   ;;  %v2096_v10 = vld [vmem:[#allocation3 + $0x10] sm:$0xff]  }
  0x16   :  { %1735 = vmatpush3.bf16.msra.mxu1 %v2089_v3  ;;  %1714 = vmatprep.subr.bf16.mxu0 %v2090_v4  ;;  %v2097_v11 = vld [vmem:[#allocation3 + $0x90] sm:$0xff]   ;;  %v2098_v12 = vld [vmem:[#allocation3 + $0x58] sm:$0xff]   ;;  %v2102_v16 = vld [vmem:[#allocation3 + $0x60] sm:$0xff]  }
  0x17   :  { %1736 = vmatprep.subr.bf16.mxu1 %v2091_v5  ;;  %v2099_v13 = vld [vmem:[#allocation3 + $0xd8] sm:$0xff]   ;;  %v2103_v17 = vld [vmem:[#allocation3 + $0xe0] sm:$0xff]   ;;  %v2106_v20 = vld [vmem:[#allocation3 + $0x68] sm:$0xff]  }
  0x18   :  { %v2100_v14 = vld [vmem:[#allocation3 + $0x18] sm:$0xff]   ;;  %v2104_v18 = vld [vmem:[#allocation3 + $0x20] sm:$0xff]   ;;  %v2107_v21 = vld [vmem:[#allocation3 + $0xe8] sm:$0xff]  }
  0x19   :  { %1715 = vmatpush3.bf16.msra.mxu0 %v2092_v6  ;;  %v2101_v15 = vld [vmem:[#allocation3 + $0x98] sm:$0xff]   ;;  %v2105_v19 = vld [vmem:[#allocation3 + $0xa0] sm:$0xff]   ;;  %v2108_v22 = vld [vmem:[#allocation3 + $0x28] sm:$0xff]   ;;  %v2222_v6 = vmov 0.0|0.0  }
  0x1a   :  { %1737 = vmatpush3.bf16.msra.mxu1 %v2093_v7  ;;  %1716 = vmatprep.subr.bf16.mxu0 %v2094_v8  ;;  %v2109_v23 = vld [vmem:[#allocation3 + $0xa8] sm:$0xff]   ;;  %v2110_v24 = vld [vmem:[#allocation3 + $0x70] sm:$0xff]   ;;  %v2114_v28 = vld [vmem:[#allocation3 + $0x78] sm:$0xff]  }
  0x1b   :  { %1738 = vmatprep.subr.bf16.mxu1 %v2095_v9  ;;  %v2111_v25 = vld [vmem:[#allocation3 + $0xf0] sm:$0xff]   ;;  %v2115_v29 = vld [vmem:[#allocation3 + $0xf8] sm:$0xff]   ;;  %v72_v32 = vld [vmem:[%s2627_s0] sm:$0xff] }
  0x1c   :  { %v2112_v26 = vld [vmem:[#allocation3 + $0x30] sm:$0xff]   ;;  %v2116_v30 = vld [vmem:[#allocation3 + $0x38] sm:$0xff]   ;;  %v73_v33 = vld [vmem:[%s2627_s0 + $0x8] sm:$0xff]  ;;  %v1628_v34 = vcombine.low %v72_v32, %v72_v32  ;;  %v1629_v35 = vcombine.high %v72_v32, %v72_v32 }
  0x1d   :  { %1717 = vmatpush3.bf16.msra.mxu0 %v2096_v10  ;;  %v2113_v27 = vld [vmem:[#allocation3 + $0xb0] sm:$0xff]   ;;  %v2117_v31 = vld [vmem:[#allocation3 + $0xb8] sm:$0xff]   ;;  %v1630_v36 = vcombine.low %v73_v33, %v73_v33  ;;  %v1631_v37 = vcombine.high %v73_v33, %v73_v33  ;;  %v2122_v38 = vld [vmem:[#allocation3 + $0x140] sm:$0xff]  }
  0x1e   :  { %1739 = vmatpush3.bf16.msra.mxu1 %v2097_v11  ;;  %1718 = vmatprep.subr.bf16.mxu0 %v2098_v12  ;;  %v2123_v39 = vld [vmem:[#allocation3 + $0x100] sm:$0xff]   ;;  %v2125_v42 = vld [vmem:[#allocation3 + $0x148] sm:$0xff]   ;;  %v2128_v45 = vld [vmem:[#allocation3 + $0x150] sm:$0xff]  }
  0x1f   :  { %1740 = vmatprep.subr.bf16.mxu1 %v2099_v13  ;;  %581 = vmatprep.mubr.bf16.mxu0 %v1629_v35  ;;  %v2124_v41 = vld [vmem:[#allocation3 + $0x180] sm:$0xff]   ;;  %v2126_v43 = vld [vmem:[#allocation3 + $0x108] sm:$0xff]   ;;  %v2130_v46 = vld [vmem:[#allocation3 + $0x190] sm:$0xff]  }
  0x20   :  { %621 = vmatprep.mubr.bf16.mxu1 %v1631_v37  ;;  %v2127_v44 = vld [vmem:[#allocation3 + $0x188] sm:$0xff]   ;;  %v2129_v47 = vld [vmem:[#allocation3 + $0x110] sm:$0xff]   ;;  %v2131_v48 = vld [vmem:[#allocation3 + $0x158] sm:$0xff]  }
  0x21   :  { %1719 = vmatpush3.bf16.msra.mxu0 %v2100_v14  ;;  %v2133_v49 = vld [vmem:[#allocation3 + $0x198] sm:$0xff]   ;;  %v2134_v51 = vld [vmem:[#allocation3 + $0x160] sm:$0xff]   ;;  %v2137_v54 = vld [vmem:[#allocation3 + $0x168] sm:$0xff]  }
  0x22   :  { %1741 = vmatpush3.bf16.msra.mxu1 %v2101_v15  ;;  %1720 = vmatprep.subr.bf16.mxu0 %v2102_v16  ;;  %v2132_v50 = vld [vmem:[#allocation3 + $0x118] sm:$0xff]   ;;  %v2136_v52 = vld [vmem:[#allocation3 + $0x1a0] sm:$0xff]   ;;  %v2139_v55 = vld [vmem:[#allocation3 + $0x1a8] sm:$0xff]  }
  0x23   :  { %1742 = vmatprep.subr.bf16.mxu1 %v2103_v17  ;;  %v2135_v53 = vld [vmem:[#allocation3 + $0x120] sm:$0xff]   ;;  %v2138_v56 = vld [vmem:[#allocation3 + $0x128] sm:$0xff]   ;;  %v2140_v57 = vld [vmem:[#allocation3 + $0x170] sm:$0xff]  }
  0x24   :  { %v74_v58 = vld [vmem:[%s2627_s0 + $0x10] sm:$0xff]  ;;  %v2143_v62 = vld [vmem:[#allocation3 + $0x178] sm:$0xff]   ;;  %v2325_v3 = vld [vmem:[%s2632_s5] sm:$0xff] }
  0x25   :  { %1721 = vmatpush3.bf16.msra.mxu0 %v2104_v18  ;;  %v2141_v59 = vld [vmem:[#allocation3 + $0x130] sm:$0xff]   ;;  %v1633_v61 = vcombine.high %v74_v58, %v74_v58  ;;  %v2147_v63 = vld [vmem:[#allocation3 + $0x1b8] sm:$0xff]   ;;  %v1632_v2 = vcombine.low %v74_v58, %v74_v58  ;;  %v2330_v4 = vld [vmem:[%s2632_s5 + $0x8] sm:$0xff]  ;;  %v2225_v58 = vmov 3  }
  0x26   :  { %1743 = vmatpush3.bf16.msra.mxu1 %v2105_v19  ;;  %1722 = vmatprep.subr.bf16.mxu0 %v2106_v20  ;;  %v2142_v60 = vld [vmem:[#allocation3 + $0x1b0] sm:$0xff]   ;;  %v2144_v0 = vld [vmem:[#allocation3 + $0x138] sm:$0xff]   ;;  %v1981_v7 = vpack.c.bf16 %v2330_v4, %v2325_v3  ;;  %v2351_v10 = vld [vmem:[%s2632_s5 + $0x20] sm:$0xff] }
  0x27   :  { %1744 = vmatprep.subr.bf16.mxu1 %v2107_v21  ;;  %v2148_v1 = vld [vmem:[%s2627_s0 + $0x18] ss:$0 sps:$4 sm:$0xff]   ;;  %v2335_v5 = vld [vmem:[%s2632_s5 + $0x10] sm:$0xff]  ;;  %v2356_v11 = vld [vmem:[%s2632_s5 + $0x28] sm:$0xff] }
  0x28   :  { %v2343_v8 = vld [vmem:[%s2632_s5 + $0x18] sm:$0xff]  ;;  %v1987_v12 = vpack.c.bf16 %v2356_v11, %v2351_v10  ;;  %v2364_v13 = vld [vmem:[%s2632_s5 + $0x30] sm:$0xff]  ;;  %v2377_v16 = vld [vmem:[%s2632_s5 + $0x40] sm:$0xff] }
  0x29   :  { %1723 = vmatpush3.bf16.msra.mxu0 %v2108_v22  ;;  %v1984_v9 = vpack.c.bf16 %v2343_v8, %v2335_v5  ;;  %v2369_v14 = vld [vmem:[%s2632_s5 + $0x38] sm:$0xff]  ;;  %v2382_v17 = vld [vmem:[%s2632_s5 + $0x48] sm:$0xff]  ;;  %v2390_v19 = vld [vmem:[%s2632_s5 + $0x50] sm:$0xff] }
  0x2a   :  { %1745 = vmatpush3.bf16.msra.mxu1 %v2109_v23  ;;  %1724 = vmatprep.subr.bf16.mxu0 %v2110_v24  ;;  %v1990_v15 = vpack.c.bf16 %v2369_v14, %v2364_v13  ;;  %v1993_v18 = vpack.c.bf16 %v2382_v17, %v2377_v16  ;;  %v2395_v20 = vld [vmem:[%s2632_s5 + $0x58] sm:$0xff]  ;;  %v2404_v22 = vld [vmem:[%s2632_s5 + $0x60] sm:$0xff]  ;;  %v2409_v23 = vld [vmem:[%s2632_s5 + $0x68] sm:$0xff] }
  0x2b   :  { %1746 = vmatprep.subr.bf16.mxu1 %v2111_v25  ;;  %v1996_v21 = vpack.c.bf16 %v2395_v20, %v2390_v19  ;;  %v1999_v24 = vpack.c.bf16 %v2409_v23, %v2404_v22  ;;  %v2417_v25 = vld [vmem:[%s2632_s5 + $0x70] sm:$0xff] }
  0x2d   :  { %1725 = vmatpush3.bf16.msra.mxu0 %v2112_v26  ;;  %v2422_v26 = vld [vmem:[%s2632_s5 + $0x78] sm:$0xff] }
  0x2e   :  { %1747 = vmatpush3.bf16.msra.mxu1 %v2113_v27  ;;  %1726 = vmatprep.subr.bf16.mxu0 %v2114_v28  ;;  %v2002_v27 = vpack.c.bf16 %v2422_v26, %v2417_v25  ;;  %v2223_v28 = vmov 2  }
  0x2f   :  { %1748 = vmatprep.subr.bf16.mxu1 %v2115_v29  ;;  %2041 = vset.pattern.permute.xlu1 %v2223_v28  ;;  %v2224_v29 = vmov 0  }
  0x30   :  { %2039 = vset.pattern.permute.xlu0 %v2224_v29 }
  0x31   :  { %1727 = vmatpush3.bf16.msra.mxu0 %v2116_v30 }
  0x32   :  { %1749 = vmatpush3.bf16.msra.mxu1 %v2117_v31  ;;  %1756 = vmatprep.subr.bf16.mxu0 %v2122_v38 }
  0x33   :  { %1844 = vmatprep.subr.bf16.mxu1 %v2220_v40 }
  0x34   :  { %582 = vmatmul.mubr.bf16.vlgmr.msra.gmra.mrb[0].mxu0 %v1628_v34 }
  0x35   :  { %622 = vmatmul.mubr.bf16.vlgmr.msra.gmra.mrb[0].mxu1 %v1630_v36  ;;  %1757 = vmatpush3.bf16.msra.mxu0 %v2123_v39 }
  0x36   :  { %1845 = vmatpush3.bf16.msra.mxu1 %v2124_v41  ;;  %1758 = vmatprep.subr.bf16.mxu0 %v2125_v42 }
  0x37   :  { %1846 = vmatprep.subr.bf16.mxu1 %v2220_v40  ;;  %1860 = vmatprep.mubr.msk.bf16.mxu1 %vm2221_vm0, %v2220_v40 }
  0x38   :  { %661 = vmatprep.mubr.bf16.mxu0 %v1633_v61 }
  0x39   :  { %1759 = vmatpush3.bf16.msra.mxu0 %v2126_v43 }
  0x3a   :  { %1847 = vmatpush3.bf16.msra.mxu1 %v2127_v44  ;;  %1760 = vmatprep.subr.bf16.mxu0 %v2128_v45 }
  0x3b   :  { %1848 = vmatprep.subr.bf16.mxu1 %v2220_v40 }
  0x3d   :  { %1761 = vmatpush3.bf16.msra.mxu0 %v2129_v47 }
  0x3e   :  { %1849 = vmatpush3.bf16.msra.mxu1 %v2130_v46  ;;  %1762 = vmatprep.subr.bf16.mxu0 %v2131_v48 }
  0x3f   :  { %1850 = vmatprep.subr.bf16.mxu1 %v2220_v40 }
  0x41   :  { %1763 = vmatpush3.bf16.msra.mxu0 %v2132_v50 }
  0x42   :  { %1851 = vmatpush3.bf16.msra.mxu1 %v2133_v49  ;;  %1764 = vmatprep.subr.bf16.mxu0 %v2134_v51 }
  0x43   :  { %1852 = vmatprep.subr.bf16.mxu1 %v2220_v40 }
  0x45   :  { %1765 = vmatpush3.bf16.msra.mxu0 %v2135_v53  ;;  %v2431_v53 = vld [vmem:[%s2631_s4] sm:$0xff] }
  0x46   :  { %1853 = vmatpush3.bf16.msra.mxu1 %v2136_v52  ;;  %1766 = vmatprep.subr.bf16.mxu0 %v2137_v54 }
  0x47   :  { %1854 = vmatprep.subr.bf16.mxu1 %v2220_v40 }
  0x49   :  { %1767 = vmatpush3.bf16.msra.mxu0 %v2138_v56 }
  0x4a   :  { %1855 = vmatpush3.bf16.msra.mxu1 %v2139_v55  ;;  %1768 = vmatprep.subr.bf16.mxu0 %v2140_v57 }
  0x4b   :  { %1856 = vmatprep.subr.bf16.mxu1 %v2220_v40 }
  0x4d   :  { %1769 = vmatpush3.bf16.msra.mxu0 %v2141_v59  ;;  %v2226_v59 = vmov 1  }
  0x4e   :  { %1857 = vmatpush3.bf16.msra.mxu1 %v2142_v60  ;;  %1770 = vmatprep.subr.bf16.mxu0 %v2143_v62  ;;  %v854_v60 = vlaneseq }
  0x4f   :  { %1858 = vmatprep.subr.bf16.mxu1 %v2220_v40 }
  0x50   :  { %v2438_v61 = vshrl.u32 %v854_v60, 7 }
  0x51   :  { %1771 = vmatpush3.bf16.msra.mxu0 %v2144_v0 }
  0x52   :  { %1859 = vmatpush3.bf16.msra.mxu1 %v2147_v63  ;;  %1980 = vmatprep.subr.bf16.mxu0 %v2222_v6  ;;  %v856_v62 = vsub.s32 0, %v2438_v61  ;;  %v874_v63 = vsub.s32 2, %v2438_v61 }
  0x53   :  { %1899 = vmatprep.subr.mxu1 %v2220_v40 }
  0x54   :  { %662 = vmatmul.mubr.bf16.vlgmr.msra.gmra.mrb[4].mxu0 %v1632_v2  ;;  %v883_v2 = vsub.s32 3, %v2438_v61 }
  0x55   :  { %1861 = vmatmul.mubr.bf16.vlgmr.msra.gmra.mrb[4].mxu1 %v2148_v1  ;;  %1896 = vmatprep.mubr.msk.f32.mxu0 %vm2221_vm0, %v2220_v40 }
  0x56   :  { %1901 = vmatprep.mubr.msk.f32.mxu1 %vm2221_vm0, %v2220_v40  ;;  %1982 = vmatpush3.bf16.msra.mxu0 %v1981_v7  ;;  %v865_v7 = vsub.s32 1, %v2438_v61 }
  0x57   :  { %1983 = vmatprep.subr.bf16.mxu0 %v2222_v6 }
  0x5a   :  { %1985 = vmatpush3.bf16.msra.mxu0 %v1984_v9 }
  0x5b   :  { %1986 = vmatprep.subr.bf16.mxu0 %v2222_v6 }
  0x5e   :  { %1988 = vmatpush3.bf16.msra.mxu0 %v1987_v12 }
  0x5f   :  { %1989 = vmatprep.subr.bf16.mxu0 %v2222_v6 }
  0x62   :  { %1991 = vmatpush3.bf16.msra.mxu0 %v1990_v15 }
  0x63   :  { %1992 = vmatprep.subr.bf16.mxu0 %v2222_v6 }
  0x66   :  { %1994 = vmatpush3.bf16.msra.mxu0 %v1993_v18 }
  0x67   :  { %1995 = vmatprep.subr.bf16.mxu0 %v2222_v6 }
  0x6a   :  { %1997 = vmatpush3.bf16.msra.mxu0 %v1996_v21 }
  0x6b   :  { %1998 = vmatprep.subr.bf16.mxu0 %v2222_v6 }
  0x6e   :  { %2000 = vmatpush3.bf16.msra.mxu0 %v1999_v24 }
  0x6f   :  { %2001 = vmatprep.subr.bf16.mxu0 %v2222_v6 }
  0x72   :  { %2003 = vmatpush3.bf16.msra.mxu0 %v2002_v27 }
  0x73   :  { %2004 = vmatprep.subr.bf16.mxu0 %v2222_v6 }
 0x107   :  { %v1728_v30 = vpop.f32.mrb[0].mxu0 }
 0x108   :  { %v1750_v31 = vpop.f32.mrb[0].mxu1  ;;  %v1729_v32 = vpop.f32.mrb[1].mxu0 }
 0x109   :  { %v1751_v33 = vpop.f32.mrb[1].mxu1  ;;  %v1730_v34 = vadd.f32 %v1729_v32, %v1728_v30  ;;  %v1731_v36 = vpop.f32.mrb[2].mxu0 }
 0x10a   :  { %v1752_v35 = vadd.f32 %v1751_v33, %v1750_v31  ;;  %v1753_v37 = vpop.f32.mrb[2].mxu1  ;;  %v1732_v38 = vpop.f32.mrb[3].mxu0 }
 0x10b   :  { %v1754_v39 = vpop.f32.mrb[3].mxu1  ;;  %v2461_v37 = vld [vmem:[%s2633_s6 + $0x8] sm:$0xff]  ;;  %v2466_v38 = vld [vmem:[%s2633_s6 + $0x18] sm:$0xff] }
 0x10c   :  { %v624_v41 = vadd.f32 %v1752_v35, %v1730_v34 }
 0x127   :  { %v1772_v43 = vpop.f32.mrb[4].mxu0 }
 0x128   :  { %v703_v42 = vpop.f32.mrb[4].mxu1  ;;  %v1773_v45 = vpop.f32.mrb[5].mxu0 }
 0x129   :  { %v1862_v44 = vpop.f32.mrb[5].mxu1  ;;  %v1774_v47 = vadd.f32 %v1773_v45, %v1772_v43  ;;  %v1775_v48 = vpop.f32.mrb[6].mxu0  ;;  %v2472_v45 = vld [vmem:[%s2633_s6 + $0x10] sm:$0xff] }
 0x12a   :  { %v706_v46 = vpop.f32.mrb[6].mxu1  ;;  %v1776_v50 = vpop.f32.mrb[7].mxu0 }
 0x12b   :  { %v1863_v49 = vpop.f32.mrb[7].mxu1  ;;  %v664_v51 = vadd.f32 %v1774_v47, %v624_v41 }
 0x12d   :  { %v704_v52 = vadd.f32 %v703_v42, %v664_v51 }
 0x12f   :  { %1897 = vmatmul.mubr.f32.vlgmr.msra.gmra.mrb[8].mxu0 %v704_v52  ;;  %1900 = vmatpush3.xpose.msra.mxu1 %v704_v52 }
 0x130   :  { %1904 = vmatprep.subr.mxu1 %v704_v52  ;;  %1964 = vmatprep.mubr.msk.f32.mxu0 %vm2221_vm0, %v2220_v40 }
 0x132   :  { %1902 = vmatmul.mubr.f32.vlgmr.msra.gmra.mrb[8].mxu1 %v2431_v53 }
 0x133   :  { %1905 = vmatpush3.msra.mxu1 %v704_v52 }
 0x134   :  { %1912 = vmatprep.subr.bf16.mxu1 %v2220_v40 }
 0x202   :  { %v775_v54 = vpop.f32.mrb[8].mxu0 }
 0x203   :  { %869 = vperm.xlu1 %2041, %v775_v54   ;;  %851 = vperm.xlu0 %2039, %v775_v54   ;;  %v1898_v55 = vpop.f32.mrb[9].mxu0 }
 0x205   :  { %v845_v56 = vpop.f32.mrb[8].mxu1 }
 0x206   :  { %v1903_v57 = vpop.f32.mrb[9].mxu1  ;;  %v857_v0 = vrot.slane %v845_v56, %v856_v62  ;;  %v875_v1 = vrot.slane %v845_v56, %v874_v63  ;;  %v884_v21 = vrot.slane %v845_v56, %v883_v2  ;;  %v866_v24 = vrot.slane %v845_v56, %v865_v7 }
 0x207   :  { %2042 = vset.pattern.permute.xlu1 %v2225_v58  ;;  %2040 = vset.pattern.permute.xlu0 %v2226_v59 }
 0x208   :  { %878 = vperm.xlu1 %2042, %v775_v54   ;;  %860 = vperm.xlu0 %2040, %v775_v54  }
 0x20c   :  { %2083 = vset.pattern.permute.xlu1 %v2224_v29  ;;  %v2455_v29 = vld [vmem:[%s2633_s6] sm:$0xff] }
 0x282   :  { %v870_v9 = vpop.permute.xlu1 %869  ;;  %v852_v12 = vpop.permute.xlu0 %851 }
 0x283   :  { %v858_v15 = vadd.f32 %v857_v0, %v852_v12  ;;  %v876_v18 = vadd.f32 %v875_v1, %v870_v9 }
 0x285   :  { %vm886_vm1 = vcmp.gt.f32.partialorder %v858_v15, 0.0  ;;  %v890_v27 = vmul.f32 0.2, %v858_v15  ;;  %v892_v33 = vmul.f32 0.2, %v876_v18  ;;  %vm888_vm3 = vcmp.gt.f32.partialorder %v876_v18, 0.0 }
 0x287   :  { %v879_v30 = vpop.permute.xlu1 %878  ;;  %v861_v31 = vpop.permute.xlu0 %860  ;;  %v894_v32 = vsel %vm886_vm1, %v858_v15, %v890_v27  ;;  %v896_v46 = vsel %vm888_vm3, %v876_v18, %v892_v33 }
 0x288   :  { %v885_v34 = vadd.f32 %v884_v21, %v879_v30  ;;  %v867_v35 = vadd.f32 %v866_v24, %v861_v31  ;;  %v898_v36 = vadd.f32 %v894_v32, %v2455_v29  ;;  %v900_v51 = vadd.f32 %v896_v46, %v2472_v45  ;;  %v2149_v46 = vld [vmem:[%s2630_s3] sm:$0xff]  }
 0x28a   :  { %vm889_vm4 = vcmp.gt.f32.partialorder %v885_v34, 0.0  ;;  %v893_v39 = vmul.f32 0.2, %v885_v34  ;;  %vm887_vm5 = vcmp.gt.f32.partialorder %v867_v35, 0.0  ;;  %v891_v41 = vmul.f32 0.2, %v867_v35 }
 0x28b   :  { %v903_v42 = vsel %vm902_vm2, %v898_v36, -inf  ;;  %v909_v52 = vsel %vm902_vm2, %v900_v51, -inf }
 0x28c   :  { %904 = vmax.xlane.f32.xlu1 %v903_v42  ;;  %v895_v43 = vsel %vm887_vm5, %v867_v35, %v891_v41  ;;  %v897_v44 = vsel %vm889_vm4, %v885_v34, %v893_v39 }
 0x28d   :  { %v899_v47 = vadd.f32 %v895_v43, %v2461_v37  ;;  %v901_v48 = vadd.f32 %v897_v44, %v2466_v38 }
 0x28f   :  { %v906_v49 = vsel %vm902_vm2, %v899_v47, -inf  ;;  %v912_v50 = vsel %vm902_vm2, %v901_v48, -inf }
 0x290   :  { %907 = vmax.xlane.f32.xlu0 %v906_v49  ;;  %913 = vmax.xlane.f32.xlu1 %v912_v50 }
 0x294   :  { %910 = vmax.xlane.f32.xlu0 %v909_v52 }
 0x319   :  { %v905_v54 = vpop.xlane.xlu1 %904 }
 0x31a   :  { %v915_v55 = vsub.f32 %v898_v36, %v905_v54  ;;  %v2151_v54 = vld [vmem:[%s2630_s3 + $0x10] sm:$0xff]  }
 0x31c   :  { %v919_v56 = vmul.f32 1.442695, %v915_v55  ;;  %v2152_v55 = vld [vmem:[%s2630_s3 + $0x18] sm:$0xff]  }
 0x31d   :  { %v908_v57 = vpop.xlane.xlu0 %907  ;;  %v914_v59 = vpop.xlane.xlu1 %913 }
 0x31e   :  { %2157 = vpow2.f32 %v919_v56  ;;  %v916_v60 = vsub.f32 %v899_v47, %v908_v57  ;;  %v918_v0 = vsub.f32 %v901_v48, %v914_v59  ;;  %v2153_v56 = vld [vmem:[%s2630_s3 + $0x20] sm:$0xff]   ;;  %v2154_v57 = vld [vmem:[%s2630_s3 + $0x28] sm:$0xff]   ;;  %v2155_v59 = vld [vmem:[%s2630_s3 + $0x30] sm:$0xff]  }
 0x320   :  { %v921_v1 = vmul.f32 1.442695, %v916_v60  ;;  %v925_v9 = vmul.f32 1.442695, %v918_v0  ;;  %v2156_v60 = vld [vmem:[%s2630_s3 + $0x38] sm:$0xff]   ;;  %v2043_v0 = vpack.i.bf16 %v2330_v4, %v2325_v3  ;;  %v2063_v3 = vpack.i.bf16 %v2382_v17, %v2377_v16 }
 0x321   :  { %v911_v12 = vpop.xlane.xlu0 %910  ;;  %v2068_v4 = vpack.i.bf16 %v2395_v20, %v2390_v19  ;;  %v1697_v20 = vld [vmem:[%s2634_s7 + $0x2] ss:$0 sm:$0xff] }
 0x322   :  { %2159 = vpow2.f32 %v921_v1  ;;  %v917_v15 = vsub.f32 %v900_v51, %v911_v12  ;;  %v2150_v51 = vld [vmem:[%s2630_s3 + $0x8] sm:$0xff]   ;;  %v2048_v1 = vpack.i.bf16 %v2343_v8, %v2335_v5  ;;  %v2058_v12 = vpack.i.bf16 %v2369_v14, %v2364_v13 }
 0x323   :  { %2161 = vpow2.f32 %v925_v9  ;;  %v2053_v9 = vpack.i.bf16 %v2356_v11, %v2351_v10  ;;  %v2073_v5 = vpack.i.bf16 %v2409_v23, %v2404_v22  ;;  %v2078_v8 = vpack.i.bf16 %v2422_v26, %v2417_v25  ;;  %v1696_v10 = vld [vmem:[%s2634_s7 + $0x1] ss:$0 sm:$0xff]  ;;  %v1695_v11 = vld [vmem:[%s2634_s7] ss:$0 sm:$0xff]  ;;  %v1698_v23 = vld [vmem:[%s2634_s7 + $0x3] ss:$0 sm:$0xff] }
 0x324   :  { %v923_v18 = vmul.f32 1.442695, %v917_v15 }
 0x326   :  { %2163 = vpow2.f32 %v923_v18 }
 0x328   :  { %v2158_v21 = vpop.eup %2157 }
 0x329   :  { %v927_v24 = vsel %vm902_vm2, %v2158_v21, 0.0 }
 0x32a   :  { %928 = vadd.xlane.f32.xlu0 %v927_v24 }
 0x32c   :  { %v2160_v27 = vpop.eup %2159 }
 0x32d   :  { %v930_v30 = vsel %vm902_vm2, %v2160_v27, 0.0  ;;  %v2162_v31 = vpop.eup %2161 }
 0x32e   :  { %931 = vadd.xlane.f32.xlu1 %v930_v30  ;;  %v936_v34 = vsel %vm902_vm2, %v2162_v31, 0.0 }
 0x330   :  { %v2164_v32 = vpop.eup %2163 }
 0x331   :  { %v933_v33 = vsel %vm902_vm2, %v2164_v32, 0.0 }
 0x332   :  { %934 = vadd.xlane.f32.xlu0 %v933_v33  ;;  %937 = vadd.xlane.f32.xlu1 %v936_v34  ;;  %v1699_v33 = vld [vmem:[%s2629_s2] ss:$0 sm:$0xff] }
 0x343   :  { %2049 = vrot.lane.b32.xlu1 %v2048_v1, %s2227_s23 }
 0x347   :  { %2054 = vrot.lane.b32.xlu1 %v2053_v9, %s2227_s23 }
 0x348   :  { %2044 = vrot.lane.b32.xlu0 %v2043_v0, %s2227_s23 }
 0x34b   :  { %2064 = vrot.lane.b32.xlu1 %v2063_v3, %s2227_s23 }
 0x34c   :  { %2059 = vrot.lane.b32.xlu0 %v2058_v12, %s2227_s23 }
 0x34f   :  { %2074 = vrot.lane.b32.xlu1 %v2073_v5, %s2227_s23 }
 0x350   :  { %2069 = vrot.lane.b32.xlu0 %v2068_v4, %s2227_s23 }
 0x354   :  { %2079 = vrot.lane.b32.xlu0 %v2078_v8, %s2227_s23 }
 0x3b7   :  { %v929_v35 = vpop.xlane.xlu0 %928 }
 0x3b8   :  { %2165 = vrcp.f32 %v929_v35 }
 0x3bb   :  { %v932_v36 = vpop.xlane.xlu1 %931 }
 0x3bc   :  { %2167 = vrcp.f32 %v932_v36 }
 0x3bf   :  { %v935_v39 = vpop.xlane.xlu0 %934  ;;  %v938_v41 = vpop.xlane.xlu1 %937 }
 0x3c0   :  { %2169 = vrcp.f32 %v935_v39 }
 0x3c1   :  { %2171 = vrcp.f32 %v938_v41 }
 0x3c2   :  { %v2166_v42 = vpop.eup %2165 }
 0x3c3   :  { %v943_v43 = vmul.f32 %v2166_v42, %v2158_v21  ;;  %v2045_v15 = vpop.permute.xlu0 %2044  ;;  %v2050_v18 = vpop.permute.xlu1 %2049 }
 0x3c4   :  { %v2047_v21 = vunpack.i.h.bf16 %v2045_v15  ;;  %v2046_v24 = vunpack.i.l.bf16 %v2045_v15  ;;  %v2051_v30 = vunpack.i.l.bf16 %v2050_v18 }
 0x3c5   :  { %1906 = vmatprep.mubr.msk.f32.mxu1 %vm902_vm2, %v943_v43 }
 0x3c6   :  { %v2168_v44 = vpop.eup %2167  ;;  %v2005_v34 = vpack.c.bf16 %v2047_v21, %v2046_v24 }
 0x3c7   :  { %v944_v47 = vmul.f32 %v2168_v44, %v2160_v27  ;;  %v2052_v27 = vunpack.i.h.bf16 %v2050_v18  ;;  %v2055_v36 = vpop.permute.xlu1 %2054  ;;  %v2060_v44 = vpop.permute.xlu0 %2059 }
 0x3c8   :  { %2006 = vmatpush3.bf16.msra.mxu0 %v2005_v34  ;;  %v2057_v41 = vunpack.i.h.bf16 %v2055_v36  ;;  %v2056_v42 = vunpack.i.l.bf16 %v2055_v36 }
 0x3c9   :  { %1907 = vmatmul.mubr.msk.f32.vlgmr.msra.gmra.mrb[10].mxu1 %vm902_vm2, %v944_v47  ;;  %v2008_v39 = vpack.c.bf16 %v2052_v27, %v2051_v30  ;;  %2007 = vmatprep.subr.bf16.mxu0 %v2222_v6 }
 0x3ca   :  { %v2170_v48 = vpop.eup %2169  ;;  %1913 = vmatpush3.bf16.msra.mxu1 %v2149_v46  ;;  %v2011_v47 = vpack.c.bf16 %v2057_v41, %v2056_v42 }
 0x3cb   :  { %v2172_v49 = vpop.eup %2171  ;;  %v945_v50 = vmul.f32 %v2170_v48, %v2164_v32  ;;  %1914 = vmatprep.subr.bf16.mxu1 %v2220_v40  ;;  %v2062_v48 = vunpack.i.h.bf16 %v2060_v44 }
 0x3cc   :  { %v946_v52 = vmul.f32 %v2172_v49, %v2162_v31  ;;  %2009 = vmatpush3.bf16.msra.mxu0 %v2008_v39  ;;  %v2061_v49 = vunpack.i.l.bf16 %v2060_v44 }
 0x3cd   :  { %1909 = vmatprep.mubr.msk.f32.mxu1 %vm902_vm2, %v945_v50  ;;  %2010 = vmatprep.subr.bf16.mxu0 %v2222_v6 }
 0x3ce   :  { %1910 = vmatmul.mubr.msk.f32.gmra.mrb[12].mxu1 %vm902_vm2, %v946_v52  ;;  %v2014_v52 = vpack.c.bf16 %v2062_v48, %v2061_v49 }
 0x3cf   :  { %1915 = vmatpush3.bf16.msra.mxu1 %v2150_v51  ;;  %1928 = vmatprep.mubr.msk.bf16.mxu1 %vm2221_vm0, %v2220_v40  ;;  %v2065_v51 = vpop.permute.xlu1 %2064 }
 0x3d0   :  { %1916 = vmatprep.subr.bf16.mxu1 %v2220_v40  ;;  %2012 = vmatpush3.bf16.msra.mxu0 %v2011_v47 }
 0x3d1   :  { %2013 = vmatprep.subr.bf16.mxu0 %v2222_v6 }
 0x3d3   :  { %1917 = vmatpush3.bf16.msra.mxu1 %v2151_v54  ;;  %v2067_v54 = vunpack.i.h.bf16 %v2065_v51  ;;  %v2075_v0 = vpop.permute.xlu1 %2074 }
 0x3d4   :  { %1918 = vmatprep.subr.bf16.mxu1 %v2220_v40  ;;  %2015 = vmatpush3.bf16.msra.mxu0 %v2014_v52  ;;  %v2077_v9 = vunpack.i.h.bf16 %v2075_v0  ;;  %v2076_v12 = vunpack.i.l.bf16 %v2075_v0 }
 0x3d5   :  { %2016 = vmatprep.subr.bf16.mxu0 %v2222_v6 }
 0x3d6   :  { %v2023_v4 = vpack.c.bf16 %v2077_v9, %v2076_v12 }
 0x3d7   :  { %1919 = vmatpush3.bf16.msra.mxu1 %v2152_v55  ;;  %v2066_v55 = vunpack.i.l.bf16 %v2065_v51 }
 0x3d8   :  { %1920 = vmatprep.subr.bf16.mxu1 %v2220_v40 }
 0x3db   :  { %1921 = vmatpush3.bf16.msra.mxu1 %v2153_v56  ;;  %v2070_v56 = vpop.permute.xlu0 %2069 }
 0x3dc   :  { %1922 = vmatprep.subr.bf16.mxu1 %v2220_v40 }
 0x3df   :  { %1923 = vmatpush3.bf16.msra.mxu1 %v2154_v57  ;;  %v2017_v57 = vpack.c.bf16 %v2067_v54, %v2066_v55  ;;  %v2080_v3 = vpop.permute.xlu0 %2079 }
 0x3e0   :  { %1924 = vmatprep.subr.bf16.mxu1 %v2220_v40  ;;  %v2081_v5 = vunpack.i.l.bf16 %v2080_v3 }
 0x3e1   :  { %2018 = vmatpush3.bf16.msra.mxu0 %v2017_v57 }
 0x3e2   :  { %2019 = vmatprep.subr.bf16.mxu0 %v2222_v6 }
 0x3e3   :  { %1925 = vmatpush3.bf16.msra.mxu1 %v2155_v59  ;;  %v2072_v59 = vunpack.i.h.bf16 %v2070_v56 }
 0x3e4   :  { %1926 = vmatprep.subr.bf16.mxu1 %v2220_v40 }
 0x3e7   :  { %1927 = vmatpush3.bf16.msra.mxu1 %v2156_v60  ;;  %v2071_v60 = vunpack.i.l.bf16 %v2070_v56 }
 0x3e8   :  { %1967 = vmatprep.subr.mxu1 %v2220_v40 }
 0x3e9   :  { %v2020_v1 = vpack.c.bf16 %v2072_v59, %v2071_v60 }
 0x3eb   :  { %2021 = vmatpush3.bf16.msra.mxu0 %v2020_v1 }
 0x3ec   :  { %2022 = vmatprep.subr.bf16.mxu0 %v2222_v6 }
 0x3ef   :  { %2024 = vmatpush3.bf16.msra.mxu0 %v2023_v4 }
 0x3f0   :  { %2025 = vmatprep.subr.bf16.mxu0 %v2222_v6 }
 0x49c   :  { %v1908_v13 = vpop.f32.mrb[10].mxu1 }
 0x49d   :  { %v1055_v14 = vmul.f32 %v1908_v13, %v1696_v10  ;;  %v1025_v16 = vpop.f32.mrb[11].mxu1  ;;  %v1320_v10 = vrot.slane %v2431_v53, 4 }
 0x49e   :  { %v1049_v17 = vmul.f32 %v1695_v11, %v1025_v16 }
 0x4a0   :  { %v1056_v19 = vadd.f32 %v1055_v14, %v1049_v17 }
 0x4a1   :  { %v1911_v22 = vpop.f32.mrb[12].mxu1 }
 0x4a2   :  { %v1035_v25 = vpop.f32.mrb[13].mxu1  ;;  %v1069_v31 = vmul.f32 %v1911_v22, %v1698_v23 }
 0x4a3   :  { %v1062_v26 = vmul.f32 %v1697_v20, %v1035_v25 }
 0x4a5   :  { %v1063_v32 = vadd.f32 %v1062_v26, %v1056_v19 }
 0x4a7   :  { %v1070_v35 = vadd.f32 %v1069_v31, %v1063_v32 }
 0x4a9   :  { %v1078_v43 = vadd.f32 %v1699_v33, %v1070_v35 }
 0x4ab   :  { %v1079_v46 = vmax.f32 %v1078_v43, 0.0 }
 0x4ad   :  { %v1080_v50 = vpack.c.bf16 %v1079_v46, %v1079_v46 }
 0x4af   :  { %1929 = vmatmul.mubr.bf16.vlgmr.msra.gmra.mrb[16].mxu1 %v1080_v50 }
 0x4b0   :  { %1969 = vmatprep.mubr.msk.f32.mxu1 %vm2221_vm0, %v2220_v40  ;;  %v2082_v40 = vunpack.i.h.bf16 %v2080_v3 }
 0x4b2   :  { %v2026_v8 = vpack.c.bf16 %v2082_v40, %v2081_v5 }
 0x4b4   :  { %2027 = vmatpush3.bf16.msra.mxu0 %v2026_v8 }
 0x582   :  { %v1179_v11 = vpop.f32.mrb[16].mxu1 }
 0x583   :  { %v1930_v13 = vpop.f32.mrb[17].mxu1  ;;  %1965 = vmatmul.mubr.f32.vlgmr.msra.gmra.mrb[10].mxu0 %v1179_v11  ;;  %1968 = vmatpush3.xpose.msra.mxu1 %v1179_v11 }
 0x584   :  { %v1182_v14 = vpop.f32.mrb[18].mxu1 }
 0x585   :  { %v1931_v16 = vpop.f32.mrb[19].mxu1 }
 0x586   :  { %1970 = vmatmul.mubr.f32.vlgmr.msra.gmra.mrb[14].mxu1 %v1320_v10 }
 0x656   :  { %v2571_v17 = vpop.f32.mrb[10].mxu0 }
 0x657   :  { %1403 = vperm.xlu0 %2040, %v2571_v17   ;;  %1394 = vperm.xlu1 %2083, %v2571_v17   ;;  %v1966_v19 = vpop.f32.mrb[11].mxu0 }
 0x658   :  { %v1590_v19 = vld [vmem:[%s2635_s8 + $0x8] sm:$0xff] }
 0x659   :  { %v1388_v20 = vpop.f32.mrb[14].mxu1 }
 0x65a   :  { %v1971_v22 = vpop.f32.mrb[15].mxu1  ;;  %v1409_v6 = vrot.slane %v1388_v20, %v865_v7  ;;  %v1400_v53 = vrot.slane %v1388_v20, %v856_v62  ;;  %v1418_v21 = vrot.slane %v1388_v20, %v874_v63 }
 0x65b   :  { %2085 = vset.pattern.permute.xlu0 %v2225_v58  ;;  %2084 = vset.pattern.permute.xlu1 %v2223_v28  ;;  %v1427_v28 = vrot.slane %v1388_v20, %v883_v2  ;;  %v1589_v22 = vld [vmem:[%s2635_s8] sm:$0xff] }
 0x65c   :  { %1421 = vperm.xlu0 %2085, %v2571_v17   ;;  %1412 = vperm.xlu1 %2084, %v2571_v17  }
 0x6d6   :  { %v1404_v23 = vpop.permute.xlu0 %1403  ;;  %v1395_v25 = vpop.permute.xlu1 %1394 }
 0x6d7   :  { %v1410_v26 = vadd.f32 %v1409_v6, %v1404_v23  ;;  %v1401_v15 = vadd.f32 %v1400_v53, %v1395_v25 }
 0x6d9   :  { %vm1430_vm6 = vcmp.gt.f32.partialorder %v1410_v26, 0.0  ;;  %v1434_v18 = vmul.f32 0.2, %v1410_v26  ;;  %vm1429_vm7 = vcmp.gt.f32.partialorder %v1401_v15, 0.0  ;;  %v1433_v58 = vmul.f32 0.2, %v1401_v15 }
 0x6db   :  { %v1422_v24 = vpop.permute.xlu0 %1421  ;;  %v1413_v27 = vpop.permute.xlu1 %1412  ;;  %v1438_v7 = vsel %vm1430_vm6, %v1410_v26, %v1434_v18  ;;  %v1437_v30 = vsel %vm1429_vm7, %v1401_v15, %v1433_v58  ;;  %v1591_v15 = vld [vmem:[%s2635_s8 + $0x10] sm:$0xff] }
 0x6dc   :  { %v1428_v31 = vadd.f32 %v1427_v28, %v1422_v24  ;;  %v1419_v62 = vadd.f32 %v1418_v21, %v1413_v27  ;;  %v1442_v32 = vadd.f32 %v1438_v7, %v2461_v37  ;;  %v1441_v33 = vadd.f32 %v1437_v30, %v2455_v29  ;;  %v1592_v21 = vld [vmem:[%s2635_s8 + $0x18] sm:$0xff] }
 0x6de   :  { %vm1432_vm8 = vcmp.gt.f32.partialorder %v1428_v31, 0.0  ;;  %v1436_v34 = vmul.f32 0.2, %v1428_v31  ;;  %vm1431_vm9 = vcmp.gt.f32.partialorder %v1419_v62, 0.0  ;;  %v1435_v35 = vmul.f32 0.2, %v1419_v62 }
 0x6df   :  { %v1448_v36 = vsel %vm902_vm2, %v1442_v32, -inf  ;;  %v1445_v2 = vsel %vm902_vm2, %v1441_v33, -inf }
 0x6e0   :  { %1449 = vmax.xlane.f32.xlu0 %v1448_v36  ;;  %1446 = vmax.xlane.f32.xlu1 %v1445_v2  ;;  %v1440_v61 = vsel %vm1432_vm8, %v1428_v31, %v1436_v34  ;;  %v1439_v63 = vsel %vm1431_vm9, %v1419_v62, %v1435_v35  ;;  %v1614_v34 = vstv %s2636_s9 }
 0x6e1   :  { %v1444_v39 = vadd.f32 %v1440_v61, %v2466_v38  ;;  %v1443_v41 = vadd.f32 %v1439_v63, %v2472_v45 }
 0x6e3   :  { %v1454_v37 = vsel %vm902_vm2, %v1444_v39, -inf  ;;  %v1451_v29 = vsel %vm902_vm2, %v1443_v41, -inf }
 0x6e4   :  { %1455 = vmax.xlane.f32.xlu0 %v1454_v37  ;;  %1452 = vmax.xlane.f32.xlu1 %v1451_v29 }
 0x76d   :  { %v1450_v42 = vpop.xlane.xlu0 %1449  ;;  %v1447_v43 = vpop.xlane.xlu1 %1446 }
 0x76e   :  { %v1458_v44 = vsub.f32 %v1442_v32, %v1450_v42  ;;  %v1457_v46 = vsub.f32 %v1441_v33, %v1447_v43 }
 0x770   :  { %v1463_v47 = vmul.f32 1.442695, %v1458_v44  ;;  %v1461_v48 = vmul.f32 1.442695, %v1457_v46 }
 0x771   :  { %v1456_v49 = vpop.xlane.xlu0 %1455  ;;  %v1453_v50 = vpop.xlane.xlu1 %1452 }
 0x772   :  { %2173 = vpow2.f32 %v1463_v47  ;;  %v1460_v51 = vsub.f32 %v1444_v39, %v1456_v49  ;;  %v1459_v52 = vsub.f32 %v1443_v41, %v1453_v50 }
 0x773   :  { %2175 = vpow2.f32 %v1461_v48 }
 0x774   :  { %v1467_v38 = vmul.f32 1.442695, %v1460_v51  ;;  %v1465_v45 = vmul.f32 1.442695, %v1459_v52 }
 0x776   :  { %2177 = vpow2.f32 %v1467_v38 }
 0x777   :  { %2179 = vpow2.f32 %v1465_v45 }
 0x77c   :  { %v2174_v54 = vpop.eup %2173 }
 0x77d   :  { %v2176_v55 = vpop.eup %2175  ;;  %v1472_v56 = vsel %vm902_vm2, %v2174_v54, 0.0 }
 0x77e   :  { %1473 = vadd.xlane.f32.xlu0 %v1472_v56  ;;  %v1469_v57 = vsel %vm902_vm2, %v2176_v55, 0.0 }
 0x77f   :  { %1470 = vadd.xlane.f32.xlu1 %v1469_v57 }
 0x780   :  { %v2178_v59 = vpop.eup %2177 }
 0x781   :  { %v2180_v60 = vpop.eup %2179  ;;  %v1478_v0 = vsel %vm902_vm2, %v2178_v59, 0.0 }
 0x782   :  { %1479 = vadd.xlane.f32.xlu0 %v1478_v0  ;;  %v1475_v1 = vsel %vm902_vm2, %v2180_v60, 0.0 }
 0x783   :  { %1476 = vadd.xlane.f32.xlu1 %v1475_v1 }
 0x794   :  { %1489 = vrot.lane.b32.xlu1 %v2571_v17, %s2227_s23 }
 0x80b   :  { %v1474_v9 = vpop.xlane.xlu0 %1473 }
 0x80c   :  { %2181 = vrcp.f32 %v1474_v9  ;;  %v1471_v12 = vpop.xlane.xlu1 %1470 }
 0x80d   :  { %2183 = vrcp.f32 %v1471_v12 }
 0x80f   :  { %v1480_v3 = vpop.xlane.xlu0 %1479 }
 0x810   :  { %2185 = vrcp.f32 %v1480_v3  ;;  %v1477_v4 = vpop.xlane.xlu1 %1476 }
 0x811   :  { %2187 = vrcp.f32 %v1477_v4 }
 0x814   :  { %v1490_v40 = vpop.permute.xlu1 %1489 }
 0x815   :  { %1972 = vmatprep.subr.mxu1 %v1490_v40 }
 0x816   :  { %v2182_v5 = vpop.eup %2181  ;;  %1973 = vmatpush3.msra.mxu1 %v1490_v40 }
 0x817   :  { %v2184_v8 = vpop.eup %2183  ;;  %v1486_v10 = vmul.f32 %v2182_v5, %v2174_v54 }
 0x818   :  { %v1485_v11 = vmul.f32 %v2184_v8, %v2176_v55 }
 0x81a   :  { %v2186_v13 = vpop.eup %2185  ;;  %1974 = vmatprep.mubr.msk.f32.mxu1 %vm902_vm2, %v1485_v11 }
 0x81b   :  { %v2188_v14 = vpop.eup %2187  ;;  %1975 = vmatmul.mubr.msk.f32.vlgmr.msra.gmra.mrb[20].mxu1 %vm902_vm2, %v1486_v10  ;;  %v1488_v16 = vmul.f32 %v2186_v13, %v2178_v59 }
 0x81c   :  { %v1487_v17 = vmul.f32 %v2188_v14, %v2180_v60 }
 0x81e   :  { %1977 = vmatprep.mubr.msk.f32.mxu1 %vm902_vm2, %v1487_v17 }
 0x81f   :  { %1978 = vmatmul.mubr.msk.f32.gmra.mrb[22].mxu1 %vm902_vm2, %v1488_v16 }
 0x8ee   :  { %v1976_v20 = vpop.f32.mrb[20].mxu1 }
 0x8ef   :  { %v1594_v6 = vmul.f32 %v1976_v20, %v1590_v19  ;;  %v1570_v53 = vpop.f32.mrb[21].mxu1 }
 0x8f0   :  { %v1593_v23 = vmul.f32 %v1589_v22, %v1570_v53 }
 0x8f1   :  { %v1601_v25 = vsel %vm1597_vm10, %v1594_v6, 0.0 }
 0x8f2   :  { %1602 = vadd.xlane.f32.xlu0 %v1601_v25  ;;  %v1979_v26 = vpop.f32.mrb[22].mxu1  ;;  %v1598_v28 = vsel %vm1597_vm10, %v1593_v23, 0.0 }
 0x8f3   :  { %v1580_v18 = vpop.f32.mrb[23].mxu1  ;;  %v1596_v24 = vmul.f32 %v1979_v26, %v1592_v21 }
 0x8f4   :  { %v1595_v58 = vmul.f32 %v1591_v15, %v1580_v18 }
 0x8f5   :  { %v1607_v7 = vsel %vm1597_vm10, %v1596_v24, 0.0 }
 0x8f6   :  { %1599 = vadd.xlane.f32.xlu0 %v1598_v28  ;;  %v1604_v27 = vsel %vm1597_vm10, %v1595_v58, 0.0 }
 0x8fa   :  { %1605 = vadd.xlane.f32.xlu0 %v1604_v27 }
 0x8fe   :  { %1608 = vadd.xlane.f32.xlu0 %v1607_v7 }
 0x97f   :  { %v1603_v30 = vpop.xlane.xlu0 %1602 }
 0x983   :  { %v1600_v31 = vpop.xlane.xlu0 %1599 }
 0x984   :  { %v1610_v32 = vadd.f32 %v1603_v30, %v1600_v31 }
 0x987   :  { %v1606_v62 = vpop.xlane.xlu0 %1605 }
 0x988   :  { %v1611_v33 = vadd.f32 %v1610_v32, %v1606_v62 }
 0x98b   :  { %v1609_v35 = vpop.xlane.xlu0 %1608 }
 0x98c   :  { %v1612_v36 = vadd.f32 %v1611_v33, %v1609_v35 }
 0x98e   :  { %v1615_v2 = vadd.f32 %v1614_v34, %v1612_v36 }
 0x990   :  { %v1616_v61 = vsub.f32 0.0, %v1615_v2 }
 0x992   :  { %v1617_v63 = vmul.f32 1.442695, %v1616_v61 }
 0x994   :  { %2189 = vpow2.f32 %v1617_v63 }
 0x99e   :  { %v2190_v39 = vpop.eup %2189 }
 0x99f   :  { %v1619_v41 = vadd.f32 1.0, %v2190_v39 }
 0x9a1   :  { %2191 = vrcp.f32 %v1619_v41 }
 0x9ab   :  { %v2192_v37 = vpop.eup %2191 }
 0x9ac   :  { %1622 = vst.msk [vmem:[%s2637_s10] sm:$0xff] %vm1621_vm11, %v2192_v37 }
 0x9ad   :  { %1627 = vsyncpa [#allocation4], 1 }

</bundles_post_ra>
